<compile_context>
chip_gen: v6e
topology: v6e:2x2x1
jax: 0.10.0
libtpu: 0.0.40
codegen_flags: <defaults>
</compile_context>

<pallas_src>
import functools
import math

import jax
import jax.numpy as jnp
from jax import lax
from jax.experimental import pallas as pl
from jax.experimental.pallas import tpu as pltpu

_NEG_PAD = -1e30   # finite stand-in for -inf logit padding (avoids inf arithmetic)
_P_ROWS = 8        # sublane-aligned parameter block at the top of the input slab


def q_kernel(in_ref, out_ref, *, d, K):
    """Single-invocation kernel: sample y, z and their log-probs for K rows.

    in_ref  : VMEM (P + 2K, W) f32, zero-padded lanes >= d:
                row 0            = Categorical logits
                row 1            = Normal mean m_z
                row 2            = Normal log-std log_s_z
                rows 3..P-1      = zeros (alignment filler)
                rows P..P+K-1    = eps   ~ N(0, 1)     per-sample normal noise
                rows P+K..P+2K-1 = u     ~ U(0, 1)     per-sample uniform noise
    out_ref : VMEM (K, W) f32 packed slab:
                cols [0, d) = z,  col d = y (as float),
                col d+1 = logp_y, col d+2 = logp_z
    """
    P = _P_ROWS
    _, W = out_ref.shape

    logits_raw = in_ref[0:1, :]                               # (1, W)
    m = in_ref[1:2, :]                                        # (1, W)
    log_s = in_ref[2:3, :]                                    # (1, W)
    eps = in_ref[P:P + K, :]                                  # (K, W)
    u_raw = in_ref[P + K:P + 2 * K, :]                        # (K, W)

    col = lax.broadcasted_iota(jnp.int32, (K, W), 1)          # (K, W)
    valid = col < d
    col1 = lax.broadcasted_iota(jnp.int32, (1, W), 1)         # (1, W)
    valid1 = col1 < d

    # --- Categorical(logits=prob): log-softmax + Gumbel-max sampling ---------
    logits = jnp.where(valid1, logits_raw, jnp.float32(_NEG_PAD))
    max_l = jnp.max(logits, axis=-1, keepdims=True)
    lse = max_l + jnp.log(jnp.sum(jnp.exp(logits - max_l), axis=-1, keepdims=True))
    log_probs = logits - lse                                  # (1, W)

    u = jnp.where(valid, u_raw, jnp.float32(0.5))             # keep logs finite
    gumbel = -jnp.log(-jnp.log(u))                            # (K, W)
    scores = jnp.where(valid, logits + gumbel, jnp.float32(_NEG_PAD))
    smax = jnp.max(scores, axis=-1, keepdims=True)            # (K, 1)
    y = jnp.min(jnp.where(scores == smax, col, jnp.int32(W)),
                axis=-1, keepdims=True)                       # (K, 1) argmax idx
    y_f = y.astype(jnp.float32)

    logp_y = jnp.sum(jnp.where(col == y, log_probs, 0.0),
                     axis=-1, keepdims=True)                  # (K, 1)

    # --- Normal(m_z, exp(log_s_z)): reparameterized sample + log_prob --------
    s = jnp.exp(log_s)                                        # (1, W)
    z = m + s * eps                                           # (K, W)
    log2pi = jnp.float32(math.log(2.0 * math.pi))
    logp_z_per = jnp.where(valid,
                           -0.5 * (eps * eps) - log_s - 0.5 * log2pi,
                           0.0)                               # (K, W)
    logp_z = jnp.sum(logp_z_per, axis=-1, keepdims=True)      # (K, 1)

    # --- pack everything into one lane-dense slab (single unmasked store) ----
    slab = jnp.where(valid, z, 0.0)
    slab = jnp.where(col == d, y_f, slab)
    slab = jnp.where(col == d + 1, logp_y, slab)
    slab = jnp.where(col == d + 2, logp_z, slab)
    out_ref[...] = slab


def _q_forward(prob, m_z, log_s_z, key, K):
    """Draw K trace samples from Q. Returns the packed (K, W) f32 slab."""
    d = prob.shape[-1]
    assert d < 2 ** 24, "y is stored as f32 in the slab; exact only for d < 2^24"
    # lane-dense width: at least 128, enough for z (d lanes) + 3 scalar columns
    W = max(128, ((d + 3 + 127) // 128) * 128)

    k_eps, k_u = jax.random.split(key)
    eps = jax.random.normal(k_eps, (K, d), jnp.float32)
    u = jax.random.uniform(k_u, (K, d), jnp.float32, minval=1e-6, maxval=1.0)

    zero_row = jnp.zeros((1, d), jnp.float32)
    slab_in = jnp.concatenate(
        [prob.reshape(1, d).astype(jnp.float32),
         m_z.reshape(1, d).astype(jnp.float32),
         log_s_z.reshape(1, d).astype(jnp.float32)]
        + [zero_row] * (_P_ROWS - 3)
        + [eps, u],
        axis=0)                                               # (P + 2K, d)
    slab_in = jnp.pad(slab_in, ((0, 0), (0, W - d)))          # (P + 2K, W)

    return pl.pallas_call(
        functools.partial(q_kernel, d=d, K=K),
        out_shape=jax.ShapeDtypeStruct((K, W), jnp.float32),
        in_specs=[pl.BlockSpec(memory_space=pltpu.MemorySpace.VMEM)],
        out_specs=pl.BlockSpec(memory_space=pltpu.MemorySpace.VMEM),
    )(slab_in)


q_forward = jax.jit(_q_forward, static_argnames=("K",))


def unpack_slab(slab, d):
    """Consumer-side unpacking of the packed output slab."""
    z = slab[:, :d]
    y = slab[:, d].astype(jnp.int32)
    logp_y = slab[:, d + 1]
    logp_z = slab[:, d + 2]
    return y, logp_y, z, logp_z


if __name__ == "__main__":
    d = 10   # number of mixture components (module default)
    K = 8    # number of trace samples drawn

    key = jax.random.PRNGKey(0)
    k_param, k_sample = jax.random.split(key)

    # Deterministic parameter init mirroring the module's __init__:
    prob = jax.random.normal(k_param, (d,), jnp.float32)   # nn.Parameter(t.randn(d))
    m_z = jnp.zeros((d,), jnp.float32)                     # nn.Parameter(t.zeros(d))
    log_s_z = jnp.zeros((d,), jnp.float32)                 # nn.Parameter(t.zeros(d))

    slab = q_forward(prob, m_z, log_s_z, k_sample, K=K)
    jax.block_until_ready(slab)

    y, logp_y, z, logp_z = unpack_slab(slab, d)

    # shape / dtype checks
    assert slab.shape == (K, 128) and slab.dtype == jnp.float32
    assert y.shape == (K,) and y.dtype == jnp.int32
    assert logp_y.shape == (K,)
    assert z.shape == (K, d)
    assert logp_z.shape == (K,)

    # semantic sanity checks
    assert bool(jnp.all((y >= 0) & (y < d)))
    log_probs_ref = jax.nn.log_softmax(prob)
    assert bool(jnp.allclose(logp_y, log_probs_ref[y], atol=1e-5))
    s_ref = jnp.exp(log_s_z)
    logp_z_ref = jnp.sum(
        -0.5 * ((z - m_z) / s_ref) ** 2 - log_s_z - 0.5 * jnp.log(2.0 * jnp.pi),
        axis=-1)
    assert bool(jnp.allclose(logp_z, logp_z_ref, atol=1e-4))
    assert bool(jnp.all(jnp.isfinite(z)))

    print("KERNEL_OK")
</pallas_src>

<mosaic_0001>
module attributes {stable_mosaic.version = 11 : i64} {
  func.func @q_kernel(%arg0: memref<24x128xf32, #tpu.memory_space<vmem>>, %arg1: memref<8x128xf32, #tpu.memory_space<vmem>>) attributes {dimension_semantics = [], scalar_prefetch = 0 : i64, scratch_operands = 0 : i64, tpu.core_type = #tpu.core_type<tc>} {
    %c0 = arith.constant 0 : index
    %c0_0 = arith.constant 0 : index
    %0 = vector.load %arg0[%c0, %c0_0] : memref<24x128xf32, #tpu.memory_space<vmem>>, vector<1x128xf32>
    %c1 = arith.constant 1 : index
    %c0_1 = arith.constant 0 : index
    %1 = vector.load %arg0[%c1, %c0_1] : memref<24x128xf32, #tpu.memory_space<vmem>>, vector<1x128xf32>
    %c2 = arith.constant 2 : index
    %c0_2 = arith.constant 0 : index
    %2 = vector.load %arg0[%c2, %c0_2] : memref<24x128xf32, #tpu.memory_space<vmem>>, vector<1x128xf32>
    %c8 = arith.constant 8 : index
    %c0_3 = arith.constant 0 : index
    %3 = vector.load %arg0[%c8, %c0_3] : memref<24x128xf32, #tpu.memory_space<vmem>>, vector<8x128xf32>
    %c16 = arith.constant 16 : index
    %c0_4 = arith.constant 0 : index
    %4 = vector.load %arg0[%c16, %c0_4] : memref<24x128xf32, #tpu.memory_space<vmem>>, vector<8x128xf32>
    %5 = tpu.iota {dimensions = array<i32: 1>} : vector<8x128xi32>
    %c10_i32 = arith.constant 10 : i32
    %6 = vector.broadcast %c10_i32 : i32 to vector<8x128xi32>
    %7 = arith.cmpi slt, %5, %6 : vector<8x128xi32>
    %8 = tpu.iota {dimensions = array<i32: 1>} : vector<1x128xi32>
    %c10_i32_5 = arith.constant 10 : i32
    %9 = vector.broadcast %c10_i32_5 : i32 to vector<1x128xi32>
    %10 = arith.cmpi slt, %8, %9 : vector<1x128xi32>
    %cst = arith.constant -1.000000e+30 : f32
    %11 = vector.broadcast %cst : f32 to vector<1x128xf32>
    %12 = arith.select %10, %0, %11 : vector<1x128xi1>, vector<1x128xf32>
    %cst_6 = arith.constant dense<0xFF800000> : vector<1xf32>
    %13 = vector.multi_reduction <maximumf>, %12, %cst_6 [1] : vector<1x128xf32> to vector<1xf32>
    %14 = vector.shape_cast %13 : vector<1xf32> to vector<1x1xf32>
    %15 = vector.broadcast %14 : vector<1x1xf32> to vector<1x128xf32>
    %16 = arith.subf %12, %15 : vector<1x128xf32>
    %17 = math.exp %16 : vector<1x128xf32>
    %cst_7 = arith.constant dense<0.000000e+00> : vector<1xf32>
    %18 = vector.multi_reduction <add>, %17, %cst_7 [1] : vector<1x128xf32> to vector<1xf32>
    %19 = vector.shape_cast %18 : vector<1xf32> to vector<1x1xf32>
    %20 = math.log %19 : vector<1x1xf32>
    %21 = arith.addf %14, %20 : vector<1x1xf32>
    %22 = vector.broadcast %21 : vector<1x1xf32> to vector<1x128xf32>
    %23 = arith.subf %12, %22 : vector<1x128xf32>
    %cst_8 = arith.constant 5.000000e-01 : f32
    %24 = vector.broadcast %cst_8 : f32 to vector<8x128xf32>
    %25 = arith.select %7, %4, %24 : vector<8x128xi1>, vector<8x128xf32>
    %26 = math.log %25 : vector<8x128xf32>
    %cst_9 = arith.constant 0.000000e+00 : f32
    %27 = vector.broadcast %cst_9 : f32 to vector<8x128xf32>
    %28 = arith.subf %27, %26 : vector<8x128xf32>
    %29 = math.log %28 : vector<8x128xf32>
    %cst_10 = arith.constant 0.000000e+00 : f32
    %30 = vector.broadcast %cst_10 : f32 to vector<8x128xf32>
    %31 = arith.subf %30, %29 : vector<8x128xf32>
    %32 = vector.broadcast %12 : vector<1x128xf32> to vector<8x128xf32>
    %33 = arith.addf %32, %31 : vector<8x128xf32>
    %cst_11 = arith.constant -1.000000e+30 : f32
    %34 = vector.broadcast %cst_11 : f32 to vector<8x128xf32>
    %35 = arith.select %7, %33, %34 : vector<8x128xi1>, vector<8x128xf32>
    %cst_12 = arith.constant dense<0xFF800000> : vector<8xf32>
    %36 = vector.multi_reduction <maximumf>, %35, %cst_12 [1] : vector<8x128xf32> to vector<8xf32>
    %37 = vector.shape_cast %36 : vector<8xf32> to vector<8x1xf32>
    %38 = vector.broadcast %37 : vector<8x1xf32> to vector<8x128xf32>
    %39 = arith.cmpf oeq, %35, %38 : vector<8x128xf32>
    %c128_i32 = arith.constant 128 : i32
    %40 = vector.broadcast %c128_i32 : i32 to vector<8x128xi32>
    %41 = arith.select %39, %5, %40 : vector<8x128xi1>, vector<8x128xi32>
    %cst_13 = arith.constant dense<2147483647> : vector<8xi32>
    %42 = vector.multi_reduction <minsi>, %41, %cst_13 [1] : vector<8x128xi32> to vector<8xi32>
    %43 = vector.shape_cast %42 : vector<8xi32> to vector<8x1xi32>
    %44 = arith.sitofp %43 : vector<8x1xi32> to vector<8x1xf32>
    %45 = vector.broadcast %43 : vector<8x1xi32> to vector<8x128xi32>
    %46 = arith.cmpi eq, %5, %45 : vector<8x128xi32>
    %cst_14 = arith.constant 0.000000e+00 : f32
    %47 = vector.shape_cast %23 : vector<1x128xf32> to vector<1x128xf32>
    %48 = vector.broadcast %47 : vector<1x128xf32> to vector<8x128xf32>
    %49 = vector.broadcast %cst_14 : f32 to vector<8x128xf32>
    %50 = arith.select %46, %48, %49 : vector<8x128xi1>, vector<8x128xf32>
    %cst_15 = arith.constant dense<0.000000e+00> : vector<8xf32>
    %51 = vector.multi_reduction <add>, %50, %cst_15 [1] : vector<8x128xf32> to vector<8xf32>
    %52 = vector.shape_cast %51 : vector<8xf32> to vector<8x1xf32>
    %53 = math.exp %2 : vector<1x128xf32>
    %54 = vector.broadcast %53 : vector<1x128xf32> to vector<8x128xf32>
    %55 = arith.mulf %54, %3 : vector<8x128xf32>
    %56 = vector.broadcast %1 : vector<1x128xf32> to vector<8x128xf32>
    %57 = arith.addf %56, %55 : vector<8x128xf32>
    %58 = arith.mulf %3, %3 : vector<8x128xf32>
    %cst_16 = arith.constant -5.000000e-01 : f32
    %59 = vector.broadcast %cst_16 : f32 to vector<8x128xf32>
    %60 = arith.mulf %59, %58 : vector<8x128xf32>
    %61 = vector.broadcast %2 : vector<1x128xf32> to vector<8x128xf32>
    %62 = arith.subf %60, %61 : vector<8x128xf32>
    %cst_17 = arith.constant 5.000000e-01 : f32
    %cst_18 = arith.constant 1.83787704 : f32
    %63 = arith.mulf %cst_17, %cst_18 : f32
    %64 = vector.broadcast %63 : f32 to vector<8x128xf32>
    %65 = arith.subf %62, %64 : vector<8x128xf32>
    %cst_19 = arith.constant 0.000000e+00 : f32
    %66 = vector.broadcast %cst_19 : f32 to vector<8x128xf32>
    %67 = arith.select %7, %65, %66 : vector<8x128xi1>, vector<8x128xf32>
    %cst_20 = arith.constant dense<0.000000e+00> : vector<8xf32>
    %68 = vector.multi_reduction <add>, %67, %cst_20 [1] : vector<8x128xf32> to vector<8xf32>
    %69 = vector.shape_cast %68 : vector<8xf32> to vector<8x1xf32>
    %cst_21 = arith.constant 0.000000e+00 : f32
    %70 = vector.broadcast %cst_21 : f32 to vector<8x128xf32>
    %71 = arith.select %7, %57, %70 : vector<8x128xi1>, vector<8x128xf32>
    %c10_i32_22 = arith.constant 10 : i32
    %72 = vector.broadcast %c10_i32_22 : i32 to vector<8x128xi32>
    %73 = arith.cmpi eq, %5, %72 : vector<8x128xi32>
    %74 = vector.shape_cast %44 : vector<8x1xf32> to vector<8x1xf32>
    %75 = vector.broadcast %74 : vector<8x1xf32> to vector<8x128xf32>
    %76 = arith.select %73, %75, %71 : vector<8x128xi1>, vector<8x128xf32>
    %c11_i32 = arith.constant 11 : i32
    %77 = vector.broadcast %c11_i32 : i32 to vector<8x128xi32>
    %78 = arith.cmpi eq, %5, %77 : vector<8x128xi32>
    %79 = vector.shape_cast %52 : vector<8x1xf32> to vector<8x1xf32>
    %80 = vector.broadcast %79 : vector<8x1xf32> to vector<8x128xf32>
    %81 = arith.select %78, %80, %76 : vector<8x128xi1>, vector<8x128xf32>
    %c12_i32 = arith.constant 12 : i32
    %82 = vector.broadcast %c12_i32 : i32 to vector<8x128xi32>
    %83 = arith.cmpi eq, %5, %82 : vector<8x128xi32>
    %84 = vector.shape_cast %69 : vector<8x1xf32> to vector<8x1xf32>
    %85 = vector.broadcast %84 : vector<8x1xf32> to vector<8x128xf32>
    %86 = arith.select %83, %85, %81 : vector<8x128xi1>, vector<8x128xf32>
    %c0_23 = arith.constant 0 : index
    %c0_24 = arith.constant 0 : index
    %87 = vector.load %arg1[%c0_23, %c0_24] : memref<8x128xf32, #tpu.memory_space<vmem>>, vector<8x128xf32>
    tpu.vector_store %arg1[%c0_23, %c0_24], %86 {strides = array<i32>} : memref<8x128xf32, #tpu.memory_space<vmem>>, vector<8x128xf32>,
    return
  }
}

</mosaic_0001>

<bundles_post_ra>
// kernel: _q_forward.3
= control target key start
LH: loop header
LB: loop body
LE: loop exit
PB: predicated region body
PF: predicated region fallthrough
CT: control target
= control target key end

     0   :  { %v14_v0 = vlaneseq  ;;  %s201_s0 = inlined_call_operand.vmem [shape: f32[24,128], index: 0, kind: input, shape index: {}]   ;;  %s202_s1 = inlined_call_operand.hbm [shape: f32[8,128], index: 1, kind: output, shape index: {}]  }
   0x1   :  { %6 = vsyncpa [#allocation3], 0  ;;  %v13_v1 = vld [vmem:[%s201_s0 + $0x10] sm:$0xff]  ;;  %v9_v8 = vld [vmem:[%s201_s0] sm:$0x1]  ;;  %vm18_vm1 = vcmask 1040384  }
   0x2   :  { %v166_v2 = vand.u32 127, %v14_v0  ;;  %v40_v7 = vshrl.u32 %v14_v0, 7  ;;  %v11_v27 = vld [vmem:[%s201_s0 + $0x2] sm:$0x1]  ;;  %v12_v33 = vld [vmem:[%s201_s0 + $0x8] sm:$0xff] }
   0x3   :  { %v72_v29 = vmul.f32 1.442695, %v11_v27  ;;  %v84_v35 = vmul.f32 %v12_v33, %v12_v33  ;;  %v117_v48 = vld [vmem:[%s201_s0 + $0x1] ss:$0 sm:$0xff]  ;;  %s152_s0 = smov [#allocation2]  }
   0x4   :  { %vm16_vm0 = vcmp.lt.s32.totalorder %v166_v2, 10  ;;  %v41_v9 = vsub.s32 0, %v40_v7  ;;  %vm96_vm4 = vcmp.eq.s32.totalorder %v166_v2, 10  ;;  %vm98_vm6 = vcmp.eq.s32.totalorder %v166_v2, 11  ;;  %s109_s16 = sshll.u32 %s152_s0, 4  ;;  %s110_s16 = int_to_ptr.vmem [resolvable:$true] %s109_s16 }
   0x5   :  { %v32_v3 = vsel %vm16_vm0, %v13_v1, 0.5  ;;  %v17_v10 = vsel %vm16_vm0, %v9_v8, -1e+30  ;;  %v85_v37 = vmul.f32 -0.5, %v84_v35  ;;  %vm100_vm7 = vcmp.eq.s32.totalorder %v166_v2, 12  ;;  %s130_s17 = scalar_lea.vmem %s110_s16, 128  ;;  %p135_p1 = scmp.lt.s32.totalorder %s110_s16, %s110_s16 }
   0x6   :  { %120 = vlog2.f32 %v32_v3  ;;  %v42_v13 = vrot.slane %v17_v10, %v41_v9  ;;  %v19_v17 = vsel %vm18_vm1, %v17_v10, -inf  ;;  %v89_v38 = vrot.slane %v11_v27, %v41_v9  ;;  %p131_p0 = scmp.ne.s32.totalorder %s110_s16, %s130_s17  ;;  %p136_p2 = scmp.lt.s32.totalorder %s130_s17, %s130_s17 }
   0x8   :  { %v90_v40 = vsub.f32 %v85_v37, %v89_v38  ;;  %p137_p3 = por %p136_p2, %p135_p1 }
   0xa   :  { %v118_v41 = vadd.f32 -0.9189385, %v90_v40  ;;  %p138_p4 = pnand %p137_p3, %p131_p0 }
   0xc   :  { %v92_v42 = vsel %vm16_vm0, %v118_v41, 0.0 }
  0x13   :  { %v121_v4 = vpop.eup %120 }
  0x14   :  { %v34_v5 = vmul.f32 0.6931472, %v121_v4 }
  0x16   :  { %v35_v6 = vsub.f32 0.0, %v34_v5 }
  0x18   :  { %122 = vlog2.f32 %v35_v6 }
  0x25   :  { %v123_v11 = vpop.eup %122 }
  0x26   :  { %v37_v12 = vmul.f32 0.6931472, %v123_v11 }
  0x28   :  { %v38_v14 = vsub.f32 0.0, %v37_v12 }
  0x2a   :  { %v43_v15 = vadd.f32 %v42_v13, %v38_v14 }
  0x2c   :  { %v44_v16 = vsel %vm16_vm0, %v43_v15, -1e+30 }
  0x2d   :  { %45 = vmax.xlane.f32.xlu0 %v44_v16 }
  0x31   :  { %20 = vmax.xlane.f32.xlu0 %v19_v17 }
  0xb6   :  { %v46_v18 = vpop.xlane.xlu0 %45 }
  0xb7   :  { %vm47_vm2 = vcmp.eq.f32.partialorder %v44_v16, %v46_v18 }
  0xb8   :  { %v48_v19 = vsel %vm47_vm2, %v166_v2, 128 }
  0xb9   :  { %v50_v20 = vshra.s32 %v48_v19, 16  ;;  %v49_v28 = vand.u32 65535, %v48_v19 }
  0xba   :  { %v21_v21 = vpop.xlane.xlu0 %20 }
  0xbb   :  { %v22_v22 = vsub.f32 %v17_v10, %v21_v21  ;;  %v52_v23 = vcvt.s32.f32 %v50_v20  ;;  %v51_v31 = vcvt.s32.f32 %v49_v28 }
  0xbd   :  { %v23_v24 = vmul.f32 1.442695, %v22_v22  ;;  %53 = vmin.xlane.f32.xlu1 %v52_v23 }
  0xbf   :  { %124 = vpow2.f32 %v23_v24 }
  0xc0   :  { %126 = vpow2.f32 %v72_v29 }
  0xcc   :  { %v125_v25 = vpop.eup %124 }
  0xcd   :  { %v25_v26 = vsel %vm18_vm1, %v125_v25, 0.0  ;;  %v127_v34 = vpop.eup %126 }
  0xce   :  { %26 = vadd.xlane.f32.xlu1 %v25_v26  ;;  %v77_v36 = vrot.slane %v127_v34, %v41_v9 }
  0xd0   :  { %v78_v39 = vmul.f32 %v77_v36, %v12_v33 }
  0xd2   :  { %v83_v51 = vadd.f32 %v117_v48, %v78_v39 }
  0xd4   :  { %v95_v56 = vsel %vm16_vm0, %v83_v51, 0.0 }
 0x146   :  { %v54_v30 = vpop.xlane.xlu1 %53 }
 0x147   :  { %vm55_vm3 = vcmp.eq.f32.partialorder %v52_v23, %v54_v30  ;;  %v60_v47 = vcvt.f32.s32 %v54_v30 }
 0x148   :  { %v56_v32 = vsel %vm55_vm3, %v51_v31, inf }
 0x149   :  { %57 = vmin.xlane.f32.xlu0 %v56_v32  ;;  %v61_v52 = vshll.u32 %v60_v47, 16 }
 0x14d   :  { %93 = vadd.xlane.f32.xlu0 %v92_v42 }
 0x157   :  { %v27_v43 = vpop.xlane.xlu1 %26 }
 0x158   :  { %128 = vlog2.f32 %v27_v43 }
 0x165   :  { %v129_v44 = vpop.eup %128 }
 0x166   :  { %v29_v45 = vmul.f32 0.6931472, %v129_v44 }
 0x168   :  { %v30_v46 = vadd.f32 %v29_v45, %v21_v21 }
 0x16a   :  { %v31_v50 = vsub.f32 %v17_v10, %v30_v46 }
 0x16c   :  { %v68_v55 = vrot.slane %v31_v50, %v41_v9 }
 0x1d2   :  { %v58_v49 = vpop.xlane.xlu0 %57 }
 0x1d3   :  { %v59_v53 = vcvt.f32.s32 %v58_v49 }
 0x1d5   :  { %v62_v54 = vadd.s32 %v61_v52, %v59_v53 }
 0x1d6   :  { %v94_v60 = vpop.xlane.xlu0 %93 }
 0x1d7   :  { %v63_v57 = vcvt.s32.f32 %v62_v54  ;;  %vm64_vm5 = vcmp.eq.s32.totalorder %v166_v2, %v62_v54 }
 0x1d8   :  { %v69_v58 = vsel %vm64_vm5, %v68_v55, 0.0 }
 0x1d9   :  { %70 = vadd.xlane.f32.xlu1 %v69_v58  ;;  %v97_v59 = vsel %vm96_vm4, %v63_v57, %v95_v56 }
 0x262   :  { %v71_v61 = vpop.xlane.xlu1 %70 }
 0x263   :  { %v99_v62 = vsel %vm98_vm6, %v71_v61, %v97_v59 }
 0x264   :  { %v101_v63 = vsel %vm100_vm7, %v94_v60, %v99_v62 }
 0x265   :  { %102 = vst [vmem:[#allocation2] sm:$0xff] %v101_v63 }
 0x266   :  { %141 = shalt.err (!%p138_p4)
}
 0x267   :  { %112 = dma.vmem_to_hbm [thread:$0]  %s110_s16, 128, %s202_s1, [#allocation3]  }
 0x268   :  { %150 = dma.done.wait [#allocation3], 128  }
 0x269   :  { %151 = vsyncadd [#allocation3], 4294967168 }
 0x26a   :  { %116 = vsyncpa [#allocation3], 1 }

</bundles_post_ra>
